<compile_context>
chip_gen: v7x
topology: tpu7x:2x2x1
jax: 0.10.0
libtpu: 0.0.40
codegen_flags: <defaults>
</compile_context>

<pallas_src>
import functools

import jax
import jax.numpy as jnp
from jax.experimental import pallas as pl
from jax.experimental.pallas import tpu as pltpu


def _round_up(x, m):
    return ((x + m - 1) // m) * m


def _critic_kernel(x_ref, ph_ref, pn_ref, out_ref, *, B, NB, NE, H, din_pad):
    """Fused Critic forward. Everything lives in VMEM; grid-less call."""
    f32 = jnp.float32
    ntot = NB + NE
    bn = B * ntot
    off_benc = din_pad              # encoder bias rows (batch-tiled)
    off_misc = off_benc + bn        # misc 8-row block: bo1 / wo2^T / scalars
    off_wo1 = off_misc + 8          # output-layer first weight (2H, H)

    # ---- unpack (static slices on refs / within one lane tile) -------------
    x = x_ref[:, 0:din_pad]                          # (BN, din_pad) zero-padded feats
    mask = x_ref[:, din_pad:din_pad + 1]             # (BN, 1) 0/1 valid mask

    w_enc = ph_ref[0:din_pad, :]                     # (din_pad, H)
    b_enc = ph_ref[off_benc:off_benc + bn, :]        # (BN, H)
    bo1 = ph_ref[off_misc:off_misc + 1, :]           # (1, H)
    wo2_row = ph_ref[off_misc + 1:off_misc + 2, :]   # (1, H)
    bb2 = ph_ref[off_misc + 2:off_misc + 3, 0:1]     # (1, 1)
    be2 = ph_ref[off_misc + 2:off_misc + 3, 1:2]     # (1, 1)
    bo2 = ph_ref[off_misc + 2:off_misc + 3, 2:3]     # (1, 1)
    wo1 = ph_ref[off_wo1:off_wo1 + 2 * H, :]         # (2H, H)

    w_bd = pn_ref[:, 0:bn]                           # (BN, BN) block-diag combine weight
    b1_col = pn_ref[:, bn:bn + 1]                    # (BN, 1)
    w2_col = pn_ref[:, bn + 1:bn + 2]                # (BN, 1)

    # ---- fused box+ems encoder: one MXU matmul ------------------------------
    # TODO(synk): ObjectEncoder / SpaceEncoder sources are not provided; they
    # are modeled as single linear projections box_dim/ems_dim -> hidden.
    vecs = jnp.dot(x, w_enc, preferred_element_type=f32) + b_enc      # (BN, H)
    # masked_fill(mask == 0, 0.) — exact compare+select (NaN/-0.0 safe).
    feats = jnp.where(mask != 0.0, vecs, 0.0)                         # (BN, H)

    # ---- both combine-MLP first layers: one block-diagonal MXU matmul -------
    h = jnp.dot(w_bd, feats, preferred_element_type=f32) + b1_col     # (BN, H)
    h = jnp.maximum(h, 0.0)

    # ---- Linear(N, 1): per-row weight (VPU) + segment sum over items (XLU) --
    # NTOT is a multiple of 8 here, so the reshape is sublane-tile aligned.
    wh = (h * w2_col).reshape(B, ntot, H)
    box_vec = jnp.sum(wh[:, 0:NB, :], axis=1) + bb2                   # (B, H)
    ems_vec = jnp.sum(wh[:, NB:ntot, :], axis=1) + be2                # (B, H)

    # ---- output layer: Linear(2H, H) -> ReLU -> Linear(H, 1) ----------------
    cat = jnp.concatenate([box_vec, ems_vec], axis=1)                 # (B, 2H)
    z = jnp.maximum(jnp.dot(cat, wo1, preferred_element_type=f32) + bo1, 0.0)
    # Final (.,1) projection on the VPU + lane reduce (no MXU round-trip).
    val = jnp.sum(z * wo2_row, axis=1, keepdims=True) + bo2           # (B, 1)
    out_ref[...] = val.astype(out_ref.dtype)


def pack_params(p, B, box_dim, ems_dim, box_num, ems_num, hidden_dim):
    """Concatenate all parameters into two slabs (done once, outside the kernel)."""
    DB, DE, NB, NE, H = box_dim, ems_dim, box_num, ems_num, hidden_dim
    f32 = jnp.float32
    din_pad = _round_up(DB + DE, 8)
    ntot = NB + NE
    bn = B * ntot

    # Stacked encoder weight, zero-padded to an 8-aligned contraction dim.
    w_enc = jnp.zeros((din_pad, H), f32)
    w_enc = w_enc.at[0:DB, :].set(p["w_obj"]).at[DB:DB + DE, :].set(p["w_sp"])

    # Per-row encoder bias (box rows then ems rows), tiled over the batch.
    b_rows = jnp.concatenate([jnp.broadcast_to(p["b_obj"], (NB, H)),
                              jnp.broadcast_to(p["b_sp"], (NE, H))], axis=0)
    b_enc = jnp.tile(b_rows, (B, 1))                                  # (BN, H)

    # Misc 8-row block: bo1 / wo2^T / scalar row [bb2, be2, bo2, 0, ...].
    misc = jnp.zeros((8, H), f32)
    misc = misc.at[0, :].set(p["bo1"][0])
    misc = misc.at[1, :].set(p["wo2"][:, 0])
    misc = misc.at[2, 0].set(p["bb2"][0, 0])
    misc = misc.at[2, 1].set(p["be2"][0, 0])
    misc = misc.at[2, 2].set(p["bo2"][0, 0])

    pslab_h = jnp.concatenate([w_enc, b_enc, misc, p["wo1"]], axis=0)  # (din_pad+BN+8+2H, H)

    # Block-diagonal combine weight (out, in): kron(I_B, blockdiag(Wb1^T, We1^T)).
    blk = jnp.zeros((ntot, ntot), f32)
    blk = blk.at[0:NB, 0:NB].set(p["wb1_t"]).at[NB:, NB:].set(p["we1_t"])
    w_bd = jnp.kron(jnp.eye(B, dtype=f32), blk)                        # (BN, BN)
    b1_col = jnp.tile(jnp.concatenate([p["bb1"], p["be1"]], axis=0), (B, 1))   # (BN, 1)
    w2_col = jnp.tile(jnp.concatenate([p["wb2"], p["we2"]], axis=0), (B, 1))   # (BN, 1)
    pslab_n = jnp.concatenate([w_bd, b1_col, w2_col], axis=1)          # (BN, BN+2)

    return {"pslab_h": pslab_h, "pslab_n": pslab_n}


@jax.jit
def critic_forward(box_states, ems, valid_mask, ems_mask, packed):
    B, NB, DB = box_states.shape
    _, NE, DE = ems.shape
    pslab_h = packed["pslab_h"]
    pslab_n = packed["pslab_n"]
    H = pslab_h.shape[1]
    din_pad = _round_up(DB + DE, 8)
    ntot = NB + NE
    bn = B * ntot
    assert pslab_n.shape == (bn, bn + 2), "params were packed for a different batch size"
    assert pslab_h.shape[0] == din_pad + bn + 8 + 2 * H

    # Pack activations + mask into one (BN, din_pad+1) slab -> a single input DMA.
    f32 = jnp.float32
    x_box = jnp.zeros((B, NB, din_pad), f32).at[:, :, 0:DB].set(box_states.astype(f32))
    x_ems = jnp.zeros((B, NE, din_pad), f32).at[:, :, DB:DB + DE].set(ems.astype(f32))
    x_all = jnp.concatenate([x_box, x_ems], axis=1).reshape(bn, din_pad)
    mask_all = jnp.concatenate([valid_mask.reshape(B, NB),
                                ems_mask.reshape(B, NE)], axis=1).astype(f32).reshape(bn, 1)
    x_slab = jnp.concatenate([x_all, mask_all], axis=1)                # (BN, din_pad+1)

    kernel = functools.partial(_critic_kernel, B=B, NB=NB, NE=NE, H=H, din_pad=din_pad)
    vmem = pl.BlockSpec(memory_space=pltpu.MemorySpace.VMEM)
    return pl.pallas_call(
        kernel,
        out_shape=jax.ShapeDtypeStruct((B, 1), jnp.float32),
        in_specs=[vmem, vmem, vmem],
        out_specs=vmem,
    )(x_slab, pslab_h, pslab_n)


def init_params(key, box_dim, ems_dim, box_num, ems_num, hidden_dim):
    ks = jax.random.split(key, 16)
    n = jax.random.normal
    f32 = jnp.float32
    return {
        # synthetic encoder projections (in, out) / row bias
        "w_obj": 0.1 * n(ks[0], (box_dim, hidden_dim), f32),
        "b_obj": 0.1 * n(ks[1], (1, hidden_dim), f32),
        "w_sp": 0.1 * n(ks[2], (ems_dim, hidden_dim), f32),
        "b_sp": 0.1 * n(ks[3], (1, hidden_dim), f32),
        # box_combine_mlp: Linear(box_num, box_num) -> ReLU -> Linear(box_num, 1)
        "wb1_t": 0.1 * n(ks[4], (box_num, box_num), f32),   # stored (out, in)
        "bb1": 0.1 * n(ks[5], (box_num, 1), f32),            # column bias
        "wb2": 0.1 * n(ks[6], (box_num, 1), f32),             # (in, out=1)
        "bb2": 0.1 * n(ks[7], (1, 1), f32),
        # ems_combine_mlp: Linear(ems_num, ems_num) -> ReLU -> Linear(ems_num, 1)
        "we1_t": 0.1 * n(ks[8], (ems_num, ems_num), f32),     # stored (out, in)
        "be1": 0.1 * n(ks[9], (ems_num, 1), f32),
        "we2": 0.1 * n(ks[10], (ems_num, 1), f32),
        "be2": 0.1 * n(ks[11], (1, 1), f32),
        # output_layer: Linear(2H, H) -> ReLU -> Linear(H, 1), (in, out) layout
        "wo1": 0.1 * n(ks[12], (2 * hidden_dim, hidden_dim), f32),
        "bo1": 0.1 * n(ks[13], (1, hidden_dim), f32),
        "wo2": 0.1 * n(ks[14], (hidden_dim, 1), f32),
        "bo2": 0.1 * n(ks[15], (1, 1), f32),
    }


def critic_reference(box_states, ems, valid_mask, ems_mask, p):
    """Pure-JAX reference mirroring the PyTorch Critic.forward semantics."""
    box_vecs = jnp.einsum('bnd,dh->bnh', box_states, p["w_obj"]) + p["b_obj"][0]
    ems_vecs = jnp.einsum('bnd,dh->bnh', ems, p["w_sp"]) + p["b_sp"][0]
    box_feats = jnp.where(valid_mask == 0.0, 0.0, box_vecs)
    ems_feats = jnp.where(ems_mask == 0.0, 0.0, ems_vecs)
    wb1 = p["wb1_t"].T
    xb = jnp.swapaxes(box_feats, 1, 2)                              # (B, H, NB)
    hb = jax.nn.relu(xb @ wb1 + p["bb1"][:, 0])
    box_vec = (hb @ p["wb2"] + p["bb2"][0])[..., 0]                 # (B, H)
    we1 = p["we1_t"].T
    xe = jnp.swapaxes(ems_feats, 1, 2)
    he = jax.nn.relu(xe @ we1 + p["be1"][:, 0])
    ems_vec = (he @ p["we2"] + p["be2"][0])[..., 0]                 # (B, H)
    cat = jnp.concatenate([box_vec, ems_vec], axis=-1)              # (B, 2H)
    z = jax.nn.relu(cat @ p["wo1"] + p["bo1"][0])
    return z @ p["wo2"] + p["bo2"][0]                               # (B, 1)


if __name__ == "__main__":
    B, box_num, ems_num = 2, 8, 8
    box_dim, ems_dim, hidden_dim = 4, 6, 32

    key = jax.random.PRNGKey(0)
    k_box, k_ems, k_par = jax.random.split(key, 3)

    # TODO(synk): obs_to_tensor (dict -> tensors) is environment glue; the
    # unpacked tensors are constructed synthetically here.
    box_states = jax.random.normal(k_box, (B, box_num, box_dim), jnp.float32)
    ems = jax.random.normal(k_ems, (B, ems_num, ems_dim), jnp.float32)
    valid_mask = (jnp.arange(box_num)[None, :] <
                  jnp.array([6, 8])[:, None]).astype(jnp.float32)[..., None]   # (B, NB, 1)
    ems_mask = (jnp.arange(ems_num)[None, :] <
                jnp.array([5, 7])[:, None]).astype(jnp.float32)[..., None]     # (B, NE, 1)

    params = init_params(k_par, box_dim, ems_dim, box_num, ems_num, hidden_dim)
    packed = pack_params(params, B, box_dim, ems_dim, box_num, ems_num, hidden_dim)
    packed = jax.tree_util.tree_map(jax.block_until_ready, packed)  # pack once, off the hot path

    out = critic_forward(box_states, ems, valid_mask, ems_mask, packed)
    jax.block_until_ready(out)

    ref = critic_reference(box_states, ems, valid_mask, ems_mask, params)
    assert out.shape == (B, 1) and out.dtype == jnp.float32
    assert jnp.allclose(out, ref, rtol=1e-2, atol=1e-2), (out, ref)
    print("KERNEL_OK")
</pallas_src>

<mosaic_0001>
module attributes {stable_mosaic.version = 11 : i64} {
  func.func @_critic_kernel(%arg0: memref<32x17xf32, #tpu.memory_space<vmem>>, %arg1: memref<120x32xf32, #tpu.memory_space<vmem>>, %arg2: memref<32x34xf32, #tpu.memory_space<vmem>>, %arg3: memref<2x1xf32, #tpu.memory_space<vmem>>) attributes {dimension_semantics = [], scalar_prefetch = 0 : i64, scratch_operands = 0 : i64, tpu.core_type = #tpu.core_type<tc>} {
    %c0 = arith.constant 0 : index
    %c0_0 = arith.constant 0 : index
    %0 = vector.load %arg0[%c0, %c0_0] : memref<32x17xf32, #tpu.memory_space<vmem>>, vector<32x16xf32>
    %c0_1 = arith.constant 0 : index
    %c16 = arith.constant 16 : index
    %1 = vector.load %arg0[%c0_1, %c16] : memref<32x17xf32, #tpu.memory_space<vmem>>, vector<32x1xf32>
    %c0_2 = arith.constant 0 : index
    %c0_3 = arith.constant 0 : index
    %2 = vector.load %arg1[%c0_2, %c0_3] : memref<120x32xf32, #tpu.memory_space<vmem>>, vector<16x32xf32>
    %c16_4 = arith.constant 16 : index
    %c0_5 = arith.constant 0 : index
    %3 = vector.load %arg1[%c16_4, %c0_5] : memref<120x32xf32, #tpu.memory_space<vmem>>, vector<32x32xf32>
    %c48 = arith.constant 48 : index
    %c0_6 = arith.constant 0 : index
    %4 = vector.load %arg1[%c48, %c0_6] : memref<120x32xf32, #tpu.memory_space<vmem>>, vector<1x32xf32>
    %c49 = arith.constant 49 : index
    %c0_7 = arith.constant 0 : index
    %5 = vector.load %arg1[%c49, %c0_7] : memref<120x32xf32, #tpu.memory_space<vmem>>, vector<1x32xf32>
    %c50 = arith.constant 50 : index
    %c0_8 = arith.constant 0 : index
    %6 = vector.load %arg1[%c50, %c0_8] : memref<120x32xf32, #tpu.memory_space<vmem>>, vector<1x1xf32>
    %c50_9 = arith.constant 50 : index
    %c1 = arith.constant 1 : index
    %7 = vector.load %arg1[%c50_9, %c1] : memref<120x32xf32, #tpu.memory_space<vmem>>, vector<1x1xf32>
    %c50_10 = arith.constant 50 : index
    %c2 = arith.constant 2 : index
    %8 = vector.load %arg1[%c50_10, %c2] : memref<120x32xf32, #tpu.memory_space<vmem>>, vector<1x1xf32>
    %c56 = arith.constant 56 : index
    %c0_11 = arith.constant 0 : index
    %9 = vector.load %arg1[%c56, %c0_11] : memref<120x32xf32, #tpu.memory_space<vmem>>, vector<64x32xf32>
    %c0_12 = arith.constant 0 : index
    %c0_13 = arith.constant 0 : index
    %10 = vector.load %arg2[%c0_12, %c0_13] : memref<32x34xf32, #tpu.memory_space<vmem>>, vector<32x32xf32>
    %c0_14 = arith.constant 0 : index
    %c32 = arith.constant 32 : index
    %11 = vector.load %arg2[%c0_14, %c32] : memref<32x34xf32, #tpu.memory_space<vmem>>, vector<32x1xf32>
    %c0_15 = arith.constant 0 : index
    %c33 = arith.constant 33 : index
    %12 = vector.load %arg2[%c0_15, %c33] : memref<32x34xf32, #tpu.memory_space<vmem>>, vector<32x1xf32>
    %cst = arith.constant dense<0.000000e+00> : vector<32x32xf32>
    %13 = tpu.matmul %0, %2, %cst {dimension_numbers = #tpu.dot_dimension_numbers<[1], [0], [0], [1], [0, 0, 1, 1], [], []>} : vector<32x16xf32>, vector<16x32xf32>, vector<32x32xf32> -> vector<32x32xf32>
    %14 = arith.addf %13, %3 : vector<32x32xf32>
    %cst_16 = arith.constant 0.000000e+00 : f32
    %15 = vector.broadcast %cst_16 : f32 to vector<32x1xf32>
    %16 = arith.cmpf one, %1, %15 : vector<32x1xf32>
    %cst_17 = arith.constant 0.000000e+00 : f32
    %17 = vector.shape_cast %16 : vector<32x1xi1> to vector<32x1xi1>
    %18 = vector.broadcast %17 : vector<32x1xi1> to vector<32x32xi1>
    %19 = vector.broadcast %cst_17 : f32 to vector<32x32xf32>
    %20 = arith.select %18, %14, %19 : vector<32x32xi1>, vector<32x32xf32>
    %cst_18 = arith.constant dense<0.000000e+00> : vector<32x32xf32>
    %21 = tpu.matmul %10, %20, %cst_18 {dimension_numbers = #tpu.dot_dimension_numbers<[1], [0], [0], [1], [0, 0, 1, 1], [], []>} : vector<32x32xf32>, vector<32x32xf32>, vector<32x32xf32> -> vector<32x32xf32>
    %22 = vector.broadcast %11 : vector<32x1xf32> to vector<32x32xf32>
    %23 = arith.addf %21, %22 : vector<32x32xf32>
    %cst_19 = arith.constant 0.000000e+00 : f32
    %24 = vector.broadcast %cst_19 : f32 to vector<32x32xf32>
    %25 = arith.maximumf %23, %24 : vector<32x32xf32>
    %26 = vector.broadcast %12 : vector<32x1xf32> to vector<32x32xf32>
    %27 = arith.mulf %25, %26 : vector<32x32xf32>
    %28 = vector.shape_cast %27 : vector<32x32xf32> to vector<2x16x32xf32>
    %29 = vector.extract_strided_slice %28 {offsets = [0, 0, 0], sizes = [2, 8, 32], strides = [1, 1, 1]} : vector<2x16x32xf32> to vector<2x8x32xf32>
    %cst_20 = arith.constant dense<0.000000e+00> : vector<2x32xf32>
    %30 = vector.multi_reduction <add>, %29, %cst_20 [1] : vector<2x8x32xf32> to vector<2x32xf32>
    %31 = vector.broadcast %6 : vector<1x1xf32> to vector<2x32xf32>
    %32 = arith.addf %30, %31 : vector<2x32xf32>
    %33 = vector.extract_strided_slice %28 {offsets = [0, 8, 0], sizes = [2, 8, 32], strides = [1, 1, 1]} : vector<2x16x32xf32> to vector<2x8x32xf32>
    %cst_21 = arith.constant dense<0.000000e+00> : vector<2x32xf32>
    %34 = vector.multi_reduction <add>, %33, %cst_21 [1] : vector<2x8x32xf32> to vector<2x32xf32>
    %35 = vector.broadcast %7 : vector<1x1xf32> to vector<2x32xf32>
    %36 = arith.addf %34, %35 : vector<2x32xf32>
    %37 = tpu.concatenate %32, %36 in 1 : vector<2x32xf32>, vector<2x32xf32> -> vector<2x64xf32>
    %cst_22 = arith.constant dense<0.000000e+00> : vector<2x32xf32>
    %38 = tpu.matmul %37, %9, %cst_22 {dimension_numbers = #tpu.dot_dimension_numbers<[1], [0], [0], [1], [0, 0, 1, 1], [], []>} : vector<2x64xf32>, vector<64x32xf32>, vector<2x32xf32> -> vector<2x32xf32>
    %39 = vector.broadcast %4 : vector<1x32xf32> to vector<2x32xf32>
    %40 = arith.addf %38, %39 : vector<2x32xf32>
    %cst_23 = arith.constant 0.000000e+00 : f32
    %41 = vector.broadcast %cst_23 : f32 to vector<2x32xf32>
    %42 = arith.maximumf %40, %41 : vector<2x32xf32>
    %43 = vector.broadcast %5 : vector<1x32xf32> to vector<2x32xf32>
    %44 = arith.mulf %42, %43 : vector<2x32xf32>
    %cst_24 = arith.constant dense<0.000000e+00> : vector<2xf32>
    %45 = vector.multi_reduction <add>, %44, %cst_24 [1] : vector<2x32xf32> to vector<2xf32>
    %46 = vector.shape_cast %45 : vector<2xf32> to vector<2x1xf32>
    %47 = vector.broadcast %8 : vector<1x1xf32> to vector<2x1xf32>
    %48 = arith.addf %46, %47 : vector<2x1xf32>
    %c0_25 = arith.constant 0 : index
    %c0_26 = arith.constant 0 : index
    %49 = vector.load %arg3[%c0_25, %c0_26] : memref<2x1xf32, #tpu.memory_space<vmem>>, vector<2x1xf32>
    tpu.vector_store %arg3[%c0_25, %c0_26], %48 {strides = array<i32>} : memref<2x1xf32, #tpu.memory_space<vmem>>, vector<2x1xf32>,
    return
  }
}

</mosaic_0001>

<bundles_post_ra>
// kernel: critic_forward.1
= control target key start
LH: loop header
LB: loop body
LE: loop exit
PB: predicated region body
PF: predicated region fallthrough
CT: control target
= control target key end

     0   :  { %vm39_vm0 = vcmask 130048   ;;  %v590_v3 = vmov 16   ;;  %v591_v8 = vmov 0   ;;  %vm185_vm5 = vcmask 261120   ;;  %s592_s29 = smov 127   ;;  %s598_s4 = smov 32   ;;  %s716_s1 = inlined_call_operand.vmem [shape: f32[120,32], index: 1, kind: input, shape index: {}]   ;;  %s717_s0 = inlined_call_operand.vmem [shape: f32[32,17], index: 0, kind: input, shape index: {}]   ;;  %s718_s2 = inlined_call_operand.vmem [shape: f32[32,34], index: 2, kind: input, shape index: {}]   ;;  %s719_s3 = inlined_call_operand.vmem [shape: f32[2,1], index: 3, kind: output, shape index: {}]  }
   0x1   :  { %v18_v0 = vld [vmem:[%s716_s1] sm:$0xff]  ;;  %v19_v1 = vld [vmem:[%s716_s1 + $0x8] sm:$0xff]  ;;  %582 = vset.pattern.permute.xlu0 %v590_v3  ;;  %583 = vset.pattern.permute.xlu1 %v590_v3  ;;  %v16_v6 = vld [vmem:[%s717_s0 + $0x10] sm:$0xff]  ;;  %v593_v16 = vmov 32   ;;  %v594_v18 = vmov 33   ;;  %v595_v42 = vmov 0.0|0.0  }
   0x2   :  { %v14_v2 = vld [vmem:[%s717_s0] sm:$0xff]  ;;  %v540_v4 = vpack.c.bf16 %v19_v1, %v18_v0  ;;  %v15_v5 = vld [vmem:[%s717_s0 + $0x8] sm:$0xff]  ;;  %v17_v7 = vld [vmem:[%s717_s0 + $0x18] sm:$0xff]  ;;  %vm139_vm2 = vcmp.ne.f32.partialorder %v16_v6, 0.0  ;;  %556 = vmatprep.subr.bf16.mxu0 %v595_v42  ;;  %vm596_vm12 = vmmov 0   ;;  %vm346_vm13 = vcmask 1041409  }
   0x3   :  { %501 = vmatprep.mubr.msk.f32.mxu1 %vm39_vm0, %v14_v2  ;;  %vm137_vm1 = vcmp.ne.f32.partialorder %v14_v2, 0.0  ;;  %vm138_vm3 = vcmp.ne.f32.partialorder %v15_v5, 0.0  ;;  %vm140_vm4 = vcmp.ne.f32.partialorder %v17_v7, 0.0  ;;  %v143_v10 = vsel %vm139_vm2, 1, %v591_v8  ;;  %v35_v13 = vld [vmem:[%s718_s2] sm:$0xff]  ;;  %v36_v15 = vld [vmem:[%s718_s2 + $0x8] sm:$0xff] }
   0x4   :  { %v141_v9 = vsel %vm137_vm1, 1, %v591_v8  ;;  %541 = vmatprep.subr.bf16.mxu1 %v540_v4  ;;  %152 = vperm.xlu1 %583, %v143_v10   ;;  %v142_v11 = vsel %vm138_vm3, 1, %v591_v8  ;;  %v144_v12 = vsel %vm140_vm4, 1, %v591_v8  ;;  %v649_v14 = vld [vmem:[%s716_s1 + $0x32] sm:$0x1]  ;;  %v38_v17 = vld [vmem:[%s718_s2 + $0x18] sm:$0xff] }
   0x5   :  { %146 = vperm.xlu0 %582, %v141_v9   ;;  %543 = vmatpush3.bf16.msra.mxu1 %v540_v4  ;;  %568 = vpush %v649_v14  ;;  %v37_v19 = vld [vmem:[%s718_s2 + $0x10] sm:$0xff]  ;;  %v21_v22 = vld [vmem:[%s716_s1 + $0x18] sm:$0xff]  ;;  %v23_v29 = vld [vmem:[%s716_s1 + $0x28] sm:$0xff]  ;;  %vm360_vm14 = vcmask 523264   ;;  %vm440_vm15 = vcmask 254976   ;;  %s599_s9 = smov 126  }
   0x6   :  { %v20_v24 = vld [vmem:[%s716_s1 + $0x10] sm:$0xff]  ;;  %v22_v31 = vld [vmem:[%s716_s1 + $0x20] sm:$0xff]  ;;  %v27_v39 = vld [vmem:[%s716_s1 + $0x38] sm:$0xff] }
   0x7   :  { %v28_v40 = vld [vmem:[%s716_s1 + $0x40] sm:$0xff]  ;;  %v29_v41 = vld [vmem:[%s716_s1 + $0x48] sm:$0xff]  ;;  %v30_v44 = vld [vmem:[%s716_s1 + $0x50] sm:$0xff] }
   0x8   :  { %502 = vmatmul.mubr.msk.f32.vlgmr.msra.gmra.mrb[0].mxu1 %vm39_vm0, %v15_v5  ;;  %155 = vperm.xlu1 %583, %v144_v12   ;;  %v557_v43 = vpack.c.bf16 %v28_v40, %v27_v39  ;;  %v560_v45 = vpack.c.bf16 %v30_v44, %v29_v41  ;;  %v31_v46 = vld [vmem:[%s716_s1 + $0x58] sm:$0xff]  ;;  %v32_v47 = vld [vmem:[%s716_s1 + $0x60] sm:$0xff]  ;;  %v33_v49 = vld [vmem:[%s716_s1 + $0x68] sm:$0xff] }
   0x9   :  { %149 = vperm.xlu0 %582, %v142_v11   ;;  %504 = vmatprep.mubr.msk.f32.mxu1 %vm39_vm0, %v16_v6  ;;  %v563_v48 = vpack.c.bf16 %v32_v47, %v31_v46  ;;  %v34_v50 = vld [vmem:[%s716_s1 + $0x70] sm:$0xff] }
   0xa   :  { %558 = vmatpush3.bf16.msra.mxu0 %v557_v43  ;;  %v566_v51 = vpack.c.bf16 %v34_v50, %v33_v49 }
   0xb   :  { %559 = vmatprep.subr.bf16.mxu0 %v595_v42 }
   0xc   :  { %505 = vmatmul.mubr.msk.f32.gmra.mrb[2].mxu1 %vm39_vm0, %v17_v7  ;;  %584 = vset.pattern.permute.xlu1 %v593_v16  ;;  %vm453_vm0 = vcmask 1024  }
   0xd   :  { %515 = vmatprep.mubr.msk.f32.mxu1 %vm185_vm5, %v35_v13  ;;  %337 = vrot.lane.b32.xlu0 %v649_v14, %s592_s29 }
   0xe   :  { %172 = vperm.xlu1 %584, %v36_v15   ;;  %585 = vset.pattern.permute.xlu0 %v593_v16 }
   0xf   :  { %561 = vmatpush3.bf16.msra.mxu0 %v560_v45 }
  0x10   :  { %562 = vmatprep.subr.bf16.mxu0 %v595_v42 }
  0x11   :  { %182 = vperm.xlu0 %585, %v38_v17  }
  0x12   :  { %586 = vset.pattern.permute.xlu1 %v594_v18 }
  0x13   :  { %288 = vperm.xlu1 %586, %v36_v15   ;;  %564 = vmatpush3.bf16.msra.mxu0 %v563_v48 }
  0x14   :  { %565 = vmatprep.subr.bf16.mxu0 %v595_v42 }
  0x15   :  { %167 = vperm.xlu0 %585, %v35_v13  }
  0x17   :  { %296 = vperm.xlu1 %586, %v38_v17   ;;  %567 = vmatpush3.bf16.msra.mxu0 %v566_v51 }
  0x19   :  { %588 = vset.pattern.permute.xlu0 %v594_v18 }
  0x1a   :  { %284 = vperm.xlu0 %588, %v35_v13  }
  0x1b   :  { %587 = vset.pattern.permute.xlu1 %v593_v16 }
  0x1c   :  { %177 = vperm.xlu1 %587, %v37_v19  }
  0x20   :  { %589 = vset.pattern.permute.xlu1 %v594_v18 }
  0x21   :  { %292 = vperm.xlu1 %589, %v37_v19  }
  0x36   :  { %s569_s29 = spop %568 }
  0x83   :  { %v153_v21 = vpop.permute.xlu1 %152 }
  0x84   :  { %v147_v20 = vpop.permute.xlu0 %146  ;;  %vm159_vm9 = vcmp.eq.s32.totalorder %v153_v21, 1 }
  0x85   :  { %vm157_vm6 = vcmp.eq.s32.totalorder %v147_v20, 1 }
  0x87   :  { %v156_v30 = vpop.permute.xlu1 %155 }
  0x88   :  { %v150_v23 = vpop.permute.xlu0 %149  ;;  %vm160_vm10 = vcmp.eq.s32.totalorder %v156_v30, 1 }
  0x89   :  { %vm158_vm7 = vcmp.eq.s32.totalorder %v150_v23, 1  ;;  %vm551_vm11 = vmpackc.low %vm160_vm10, %vm159_vm9 }
  0x8a   :  { %vm545_vm8 = vmpackc.low %vm158_vm7, %vm157_vm6 }
  0x8c   :  { %v338_v36 = vpop.permute.xlu0 %337 }
  0x8d   :  { %570 = vpush %v338_v36  ;;  %v173_v52 = vpop.permute.xlu1 %172 }
  0x90   :  { %v183_v54 = vpop.permute.xlu0 %182 }
  0x92   :  { %v289_v53 = vpop.permute.xlu1 %288 }
  0x94   :  { %v168_v56 = vpop.permute.xlu0 %167 }
  0x96   :  { %v297_v55 = vpop.permute.xlu1 %296 }
  0x99   :  { %v285_v63 = vpop.permute.xlu0 %284 }
  0x9b   :  { %v178_v60 = vpop.permute.xlu1 %177 }
  0xa0   :  { %v293_v9 = vpop.permute.xlu1 %292 }
  0xbe   :  { %s571_s30 = spop %570 }
  0xbf   :  { %v340_v42 = vstv %s571_s30 }
  0xdb   :  { %v503_v25 = vpop.f32.mrb[0].mxu1 }
  0xdc   :  { %v124_v26 = vadd.f32 %v503_v25, %v21_v22  ;;  %v118_v27 = vpop.f32.mrb[1].mxu1 }
  0xdd   :  { %v119_v28 = vadd.f32 %v118_v27, %v20_v24  ;;  %v597_v27 = vmov 0.0  }
  0xde   :  { %537 = vmatprep.mubr.msk.f32.mxu0 %vm596_vm12, %v597_v27 }
  0xdf   :  { %v544_v32 = vpack.c.bf16 %v124_v26, %v119_v28  ;;  %v506_v33 = vpop.f32.mrb[2].mxu1 }
  0xe0   :  { %v134_v34 = vadd.f32 %v506_v33, %v23_v29  ;;  %v128_v35 = vpop.f32.mrb[3].mxu1 }
  0xe1   :  { %v129_v37 = vadd.f32 %v128_v35, %v22_v31  ;;  %546 = vmatprep.subr.msk.bf16.mxu1 %vm545_vm8, %v544_v32 }
  0xe2   :  { %549 = vmatpush3.bf16.msk.msra.mxu1 %vm545_vm8, %v544_v32 }
  0xe3   :  { %v550_v38 = vpack.c.bf16 %v134_v34, %v129_v37  ;;  %v319_v34 = vstv %s569_s29 }
  0xe5   :  { %552 = vmatprep.subr.msk.bf16.mxu1 %vm551_vm11, %v550_v38 }
  0xe6   :  { %555 = vmatpush3.bf16.msk.msra.mxu1 %vm551_vm11, %v550_v38 }
  0xe9   :  { %516 = vmatmul.mubr.msk.f32.vlgmr.msra.gmra.mrb[4].mxu1 %vm185_vm5, %v36_v15 }
  0xea   :  { %518 = vmatprep.mubr.msk.f32.mxu1 %vm185_vm5, %v37_v19 }
  0xed   :  { %519 = vmatmul.mubr.msk.f32.gmra.mrb[6].mxu1 %vm185_vm5, %v38_v17 }
 0x1bc   :  { %v517_v57 = vpop.f32.mrb[4].mxu1 }
 0x1bd   :  { %v266_v58 = vadd.f32 %v517_v57, %v173_v52  ;;  %v260_v59 = vpop.f32.mrb[5].mxu1  ;;  %v471_v52 = vld [vmem:[%s716_s1 + $0x30] ss:$0 sm:$0xff] }
 0x1be   :  { %v261_v61 = vadd.f32 %v260_v59, %v168_v56  ;;  %v473_v56 = vld [vmem:[%s716_s1 + $0x31] ss:$0 sm:$0xff] }
 0x1bf   :  { %v280_v62 = vmax.f32 %v266_v58, 0.0 }
 0x1c0   :  { %v279_v0 = vmax.f32 %v261_v61, 0.0  ;;  %v520_v1 = vpop.f32.mrb[6].mxu1 }
 0x1c1   :  { %v300_v2 = vmul.f32 %v289_v53, %v280_v62  ;;  %v276_v3 = vadd.f32 %v520_v1, %v183_v54  ;;  %v270_v4 = vpop.f32.mrb[7].mxu1 }
 0x1c2   :  { %v299_v5 = vmul.f32 %v285_v63, %v279_v0  ;;  %v271_v6 = vadd.f32 %v270_v4, %v178_v60  ;;  %v444_v60 = vlaneseq }
 0x1c3   :  { %v323_v7 = vsel %vm185_vm5, %v300_v2, 0.0  ;;  %v282_v8 = vmax.f32 %v276_v3, 0.0 }
 0x1c4   :  { %v324_v10 = vrot.slane %v323_v7, 4  ;;  %v303_v11 = vsel %vm185_vm5, %v299_v5, 0.0  ;;  %v281_v12 = vmax.f32 %v271_v6, 0.0  ;;  %v445_v61 = vshrl.u32 %v444_v60, 7 }
 0x1c5   :  { %v302_v13 = vmul.f32 %v297_v55, %v282_v8  ;;  %v304_v15 = vrot.slane %v303_v11, 4 }
 0x1c6   :  { %v325_v16 = vadd.f32 %v324_v10, %v323_v7  ;;  %v301_v17 = vmul.f32 %v293_v9, %v281_v12  ;;  %v446_v62 = vsub.s32 0, %v445_v61 }
 0x1c7   :  { %v330_v18 = vsel %vm185_vm5, %v302_v13, 0.0  ;;  %v305_v19 = vadd.f32 %v304_v15, %v303_v11 }
 0x1c8   :  { %v331_v20 = vrot.slane %v330_v18, 4  ;;  %v310_v21 = vsel %vm185_vm5, %v301_v17, 0.0  ;;  %v326_v22 = vrot.slane %v325_v16, 2  ;;  %v447_v63 = vrot.slane %v649_v14, %v446_v62 }
 0x1c9   :  { %v306_v23 = vrot.slane %v305_v19, 2  ;;  %v311_v24 = vrot.slane %v310_v21, 4 }
 0x1ca   :  { %v332_v25 = vadd.f32 %v331_v20, %v330_v18  ;;  %v327_v26 = vadd.f32 %v326_v22, %v325_v16 }
 0x1cb   :  { %v312_v28 = vadd.f32 %v311_v24, %v310_v21  ;;  %v307_v29 = vadd.f32 %v306_v23, %v305_v19 }
 0x1cc   :  { %v328_v30 = vrot.slane %v327_v26, 1  ;;  %v333_v31 = vrot.slane %v332_v25, 2 }
 0x1cd   :  { %v313_v32 = vrot.slane %v312_v28, 2  ;;  %v308_v33 = vrot.slane %v307_v29, 1 }
 0x1ce   :  { %v334_v35 = vadd.f32 %v333_v31, %v332_v25  ;;  %v329_v38 = vadd.f32 %v328_v30, %v327_v26 }
 0x1cf   :  { %v309_v36 = vadd.f32 %v308_v33, %v307_v29  ;;  %v314_v37 = vadd.f32 %v313_v32, %v312_v28 }
 0x1d0   :  { %v335_v39 = vrot.slane %v334_v35, 1  ;;  %v342_v45 = vadd.f32 %v340_v42, %v329_v38 }
 0x1d1   :  { %v315_v40 = vrot.slane %v314_v37, 1  ;;  %v321_v41 = vadd.f32 %v319_v34, %v309_v36 }
 0x1d2   :  { %v336_v43 = vadd.f32 %v335_v39, %v334_v35 }
 0x1d3   :  { %v316_v44 = vadd.f32 %v315_v40, %v314_v37 }
 0x1d4   :  { %v343_v46 = vadd.f32 %v340_v42, %v336_v43 }
 0x1d5   :  { %v322_v47 = vadd.f32 %v319_v34, %v316_v44 }
 0x1d6   :  { %v351_v48 = vsel %vm346_vm13, %v343_v46, %v342_v45 }
 0x1d7   :  { %352 = vrot.lane.b32.xlu1 %v351_v48, %s598_s4  ;;  %v347_v49 = vsel %vm346_vm13, %v322_v47, %v321_v41 }
 0x249   :  { %v353_v50 = vpop.permute.xlu1 %352 }
 0x24a   :  { %v355_v51 = vsel %vm185_vm5, %v347_v49, %v353_v50 }
 0x24b   :  { %538 = vmatmul.mubr.msk.f32.vlgmr.msra.gmra.mrb[0].mxu0 %vm360_vm14, %v355_v51 }
 0x31e   :  { %v430_v53 = vpop.f32.mrb[0].mxu0 }
 0x31f   :  { %v431_v54 = vadd.f32 %v471_v52, %v430_v53  ;;  %v539_v55 = vpop.f32.mrb[1].mxu0 }
 0x321   :  { %v434_v57 = vmax.f32 %v431_v54, 0.0 }
 0x323   :  { %v439_v58 = vmul.f32 %v473_v56, %v434_v57 }
 0x325   :  { %v441_v59 = vsel %vm440_vm15, %v439_v58, 0.0 }
 0x326   :  { %442 = vadd.xlane.f32.xlu0 %v441_v59 }
 0x3b3   :  { %v443_v0 = vpop.xlane.xlu0 %442 }
 0x3b4   :  { %v448_v1 = vadd.f32 %v447_v63, %v443_v0 }
 0x3b6   :  { %450 = vrot.lane.b32.xlu1 %v448_v1, %s599_s9 }
 0x428   :  { %v451_v2 = vpop.permute.xlu1 %450 }
 0x429   :  { %454 = vst.msk [vmem:[%s719_s3] sm:$0x3] %vm453_vm0, %v451_v2 }

</bundles_post_ra>
